<compile_context>
chip_gen: v6e
topology: v6e:2x2x1
jax: 0.10.0
libtpu: 0.0.40
codegen_flags: <defaults>
</compile_context>

<pallas_src>
import functools

import jax
import jax.numpy as jnp
from jax import lax
from jax.experimental import pallas as pl
from jax.experimental.pallas import tpu as pltpu


# --------------------------------------------------------------------------
# Hardware-aware budgets & tile helpers
# --------------------------------------------------------------------------
def _vmem_limit_bytes():
    """Generation-aware scoped-VMEM limit (leaves headroom for compiler scratch)."""
    phys = None
    try:
        phys = int(pltpu.get_tpu_info().vmem_capacity_bytes)
    except Exception:
        phys = None
    if phys is None or phys <= (64 << 20):
        return 48 << 20          # v7x-class (64 MiB physical) or unknown: stay safe
    return 96 << 20              # v5e / v6e: 128 MiB physical VMEM


def _largest_dividing_multiple(dim, unit, cap):
    """Largest multiple of `unit` that divides `dim` and is <= cap (None if none)."""
    if dim % unit != 0 or cap < unit:
        return None
    t = min((cap // unit) * unit, dim)
    while t >= unit:
        if dim % t == 0:
            return t
        t -= unit
    return None


# --------------------------------------------------------------------------
# Fused single-pass kernel: pool + MLP + hsigmoid + rescale
# --------------------------------------------------------------------------
def _se_fused_kernel(x_ref, w1_ref, w2_ref, o_ref, *, inv_hw):
    # x_ref/o_ref: (tb, C, HW); w1_ref: (Cr, C); w2_ref: (C, Cr)
    # Global average pool, accumulated in f32.
    mean = jnp.sum(x_ref[...], axis=-1, dtype=jnp.float32) * inv_hw        # (tb, C)
    # Bottleneck MLP with NT dot_generals (contract channel dims, no transposes).
    h = lax.dot_general(mean, w1_ref[...].astype(jnp.float32),
                        dimension_numbers=(((1,), (1,)), ((), ())),
                        preferred_element_type=jnp.float32)                # (tb, Cr)
    h = jnp.maximum(h, 0.0)
    z = lax.dot_general(h, w2_ref[...].astype(jnp.float32),
                        dimension_numbers=(((1,), (1,)), ((), ())),
                        preferred_element_type=jnp.float32)                # (tb, C)
    s = jnp.clip(z + 3.0, 0.0, 6.0) * (1.0 / 6.0)                          # hsigmoid
    # Rescale in f32 (single rounding), cast once on the store.
    o_ref[...] = (x_ref[...].astype(jnp.float32) * s[:, :, None]).astype(o_ref.dtype)


# --------------------------------------------------------------------------
# Fallback pass 1: global average pool + bottleneck MLP
# --------------------------------------------------------------------------
def _pool_mlp_kernel(x_ref, w1_ref, w2_ref, s_ref, acc_ref, *, inv_hw):
    # x_ref: (tb, C, thw); w1_ref: (Cr, C); w2_ref: (C, Cr)
    # s_ref: (tb, C) f32 output; acc_ref: (tb, C) f32 running spatial sum.
    k = pl.program_id(1)

    @pl.when(k == 0)
    def _():
        acc_ref[...] = jnp.zeros_like(acc_ref)

    acc_ref[...] += jnp.sum(x_ref[...], axis=-1, dtype=jnp.float32)

    @pl.when(k == pl.num_programs(1) - 1)
    def _():
        mean = acc_ref[...] * inv_hw                                        # (tb, C)
        h = lax.dot_general(mean, w1_ref[...].astype(jnp.float32),
                            dimension_numbers=(((1,), (1,)), ((), ())),
                            preferred_element_type=jnp.float32)             # (tb, Cr)
        h = jnp.maximum(h, 0.0)
        z = lax.dot_general(h, w2_ref[...].astype(jnp.float32),
                            dimension_numbers=(((1,), (1,)), ((), ())),
                            preferred_element_type=jnp.float32)             # (tb, C)
        s_ref[...] = jnp.clip(z + 3.0, 0.0, 6.0) * (1.0 / 6.0)              # hsigmoid


# --------------------------------------------------------------------------
# Fallback pass 2: streaming channel-wise rescale
# --------------------------------------------------------------------------
def _rescale_kernel(x_ref, s_ref, o_ref):
    # x_ref/o_ref: (tr, thw); s_ref: (tr, 1) f32, lane-broadcast.
    # Multiply in f32 (single rounding vs the reference), cast once on the store.
    o_ref[...] = (x_ref[...].astype(jnp.float32) * s_ref[...]).astype(o_ref.dtype)


# --------------------------------------------------------------------------
# Wrapper
# --------------------------------------------------------------------------
def se_module(x, w1, w2, *, force_two_pass=False):
    """x: (B, C, H, W) NCHW.  w1: (C//r, C), w2: (C, C//r) (PyTorch Linear weights)."""
    b, c, hh, ww = x.shape
    hw = hh * ww
    cr = w1.shape[0]
    itemsize = x.dtype.itemsize
    x3 = x.reshape(b, c, hw)

    vmem_limit = _vmem_limit_bytes()
    w_bytes = w1.size * w1.dtype.itemsize + w2.size * w2.dtype.itemsize

    # ---------------- fused single-pass path ----------------
    per_sample = c * hw * itemsize
    # in + out blocks, each double-buffered (4x block), plus weights and headroom.
    fused_budget = max(0, vmem_limit - 4 * w_bytes) // 6
    if per_sample <= fused_budget and not force_two_pass:
        tb = min(b, max(1, fused_budget // per_sample))
        if b >= 2:
            tb = min(tb, b // 2)          # keep >= 2 "parallel" steps (v7x megacore)
        while b % tb:
            tb -= 1
        out = pl.pallas_call(
            functools.partial(_se_fused_kernel, inv_hw=1.0 / hw),
            out_shape=jax.ShapeDtypeStruct((b, c, hw), x.dtype),
            grid_spec=pltpu.PrefetchScalarGridSpec(
                num_scalar_prefetch=0,
                grid=(b // tb,),
                in_specs=[
                    pl.BlockSpec((tb, c, hw), lambda i: (i, 0, 0)),
                    pl.BlockSpec((cr, c), lambda i: (0, 0)),   # constant index -> fetched once
                    pl.BlockSpec((c, cr), lambda i: (0, 0)),
                ],
                out_specs=pl.BlockSpec((tb, c, hw), lambda i: (i, 0, 0)),
            ),
            compiler_params=pltpu.CompilerParams(
                dimension_semantics=("parallel",),
                vmem_limit_bytes=vmem_limit),
            cost_estimate=pl.CostEstimate(
                flops=2 * b * c * hw + 4 * b * c * cr,
                transcendentals=0,
                bytes_accessed=2 * b * c * hw * itemsize + w_bytes),
        )(x3, w1, w2)
        return out.reshape(b, c, hh, ww)

    # ---------------- two-pass fallback (oversized C*HW slabs) ----------------
    # Pass 1: global average pool + bottleneck MLP.
    budget1 = min(8 << 20, max(1 << 20, (vmem_limit - 4 * w_bytes) // 4))
    cap_elems = max(128, budget1 // max(1, c * itemsize))   # bound C*thw jointly
    thw = _largest_dividing_multiple(hw, 128, cap_elems)
    if thw is None:
        # HW not a multiple of 128: fall back to full spatial rows per block.
        # TODO(synk): main+remainder spatial split for non-128-multiple HW with huge C*HW.
        thw = hw
    blk = max(1, c * thw * itemsize)
    tb = min(b, max(1, budget1 // blk))
    while b % tb:
        tb -= 1
    if b >= 2:
        cand = min(tb, max(1, b // 2))       # feed both v7x TensorCores
        while b % cand:
            cand -= 1
        if cand % 8 == 0 or cand == b:       # keep the (tb, C) out block sublane-legal
            tb = cand

    scale = pl.pallas_call(
        functools.partial(_pool_mlp_kernel, inv_hw=1.0 / hw),
        out_shape=jax.ShapeDtypeStruct((b, c), jnp.float32),
        grid_spec=pltpu.PrefetchScalarGridSpec(
            num_scalar_prefetch=0,
            grid=(b // tb, hw // thw),       # spatial reduction axis last
            in_specs=[
                pl.BlockSpec((tb, c, thw), lambda i, k: (i, 0, k)),
                pl.BlockSpec((cr, c), lambda i, k: (0, 0)),
                pl.BlockSpec((c, cr), lambda i, k: (0, 0)),
            ],
            out_specs=pl.BlockSpec((tb, c), lambda i, k: (i, 0)),
            scratch_shapes=[pltpu.VMEM((tb, c), jnp.float32)],
        ),
        compiler_params=pltpu.CompilerParams(
            dimension_semantics=("parallel", "arbitrary"),
            vmem_limit_bytes=vmem_limit),
        cost_estimate=pl.CostEstimate(
            flops=b * c * hw + 4 * b * c * cr,
            transcendentals=0,
            bytes_accessed=b * c * hw * itemsize + w_bytes + b * c * 4),
    )(x3, w1, w2)

    # Pass 2: streaming channel-wise rescale on a (B*C, HW) view.
    rows = b * c
    x2 = x3.reshape(rows, hw)
    s2 = scale.reshape(rows, 1)
    budget2 = min(8 << 20, max(1 << 20, vmem_limit // 6))   # in + out, double-buffered
    thw2 = _largest_dividing_multiple(hw, 128, min(hw, 2048))
    if thw2 is None:
        # TODO(synk): a channels-last view for late-stage SE (HW < 128, C >= 128)
        # would keep stores lane-dense; here HW stays on the lane axis.
        thw2 = hw
    tr_cap = min(1024, rows, max(8, budget2 // max(1, thw2 * itemsize)))
    tr = _largest_dividing_multiple(rows, 8, tr_cap)
    if tr is None:
        tr = rows    # rows not a multiple of 8: whole-row block stays sublane-legal

    out = pl.pallas_call(
        _rescale_kernel,
        out_shape=jax.ShapeDtypeStruct((rows, hw), x.dtype),
        grid_spec=pltpu.PrefetchScalarGridSpec(
            num_scalar_prefetch=0,
            grid=(rows // tr, hw // thw2),
            in_specs=[
                pl.BlockSpec((tr, thw2), lambda i, j: (i, j)),
                pl.BlockSpec((tr, 1), lambda i, j: (i, 0)),
            ],
            out_specs=pl.BlockSpec((tr, thw2), lambda i, j: (i, j)),
        ),
        compiler_params=pltpu.CompilerParams(
            dimension_semantics=("parallel", "parallel"),
            vmem_limit_bytes=vmem_limit),
        cost_estimate=pl.CostEstimate(
            flops=rows * hw,
            transcendentals=0,
            bytes_accessed=2 * rows * hw * itemsize + rows * 4),
    )(x2, s2)

    return out.reshape(b, c, hh, ww)


def se_module_ref(x, w1, w2):
    """Pure-JAX reference matching the PyTorch forward."""
    y = jnp.mean(x.astype(jnp.float32), axis=(2, 3))              # (B, C)
    y = jnp.maximum(y @ w1.astype(jnp.float32).T, 0.0)            # (B, Cr)
    y = y @ w2.astype(jnp.float32).T                              # (B, C)
    y = jnp.clip(y + 3.0, 0.0, 6.0) / 6.0                         # hsigmoid
    return (x.astype(jnp.float32) * y[:, :, None, None]).astype(x.dtype)


if __name__ == "__main__":
    key = jax.random.PRNGKey(0)
    B, C, H, W = 2, 8, 16, 16
    reduction = 4
    Cr = C // reduction

    kx, k1, k2 = jax.random.split(key, 3)
    x = jax.random.normal(kx, (B, C, H, W), dtype=jnp.float32)
    # Deterministic synthetic weights (shapes match nn.Linear(C, Cr) / nn.Linear(Cr, C))
    w1 = jax.random.normal(k1, (Cr, C), dtype=jnp.float32) * (1.0 / jnp.sqrt(C))
    w2 = jax.random.normal(k2, (C, Cr), dtype=jnp.float32) * (1.0 / jnp.sqrt(Cr))

    ref = jax.block_until_ready(se_module_ref(x, w1, w2))

    # Fused single-pass path (the common case: per-sample slab fits VMEM).
    out = jax.block_until_ready(se_module(x, w1, w2))
    assert out.shape == x.shape
    assert jnp.allclose(out, ref, atol=1e-5, rtol=1e-5), \
        float(jnp.max(jnp.abs(out - ref)))

    # Two-pass fallback path (used when C*H*W per sample exceeds the VMEM budget).
    out2 = jax.block_until_ready(se_module(x, w1, w2, force_two_pass=True))
    assert jnp.allclose(out2, ref, atol=1e-5, rtol=1e-5), \
        float(jnp.max(jnp.abs(out2 - ref)))

    print("KERNEL_OK")
</pallas_src>

<mosaic_0001>
module attributes {stable_mosaic.version = 11 : i64} {
  func.func @_se_fused_kernel(%arg0: i32, %arg1: memref<1x8x256xf32, #tpu.memory_space<vmem>>, %arg2: memref<2x8xf32, #tpu.memory_space<vmem>>, %arg3: memref<8x2xf32, #tpu.memory_space<vmem>>, %arg4: memref<1x8x256xf32, #tpu.memory_space<vmem>>) attributes {dimension_semantics = [#tpu.dimension_semantics<parallel>], iteration_bounds = array<i64: 2>, scalar_prefetch = 0 : i64, scratch_operands = 0 : i64, tpu.core_type = #tpu.core_type<tc>, window_params = [{transform_indices = @transform_0, window_bounds = array<i64: 1, 8, 256>}, {pipeline_mode = #tpu.pipeline_mode<synchronous>, transform_indices = @transform_1, window_bounds = array<i64: 2, 8>}, {pipeline_mode = #tpu.pipeline_mode<synchronous>, transform_indices = @transform_2, window_bounds = array<i64: 8, 2>}, {transform_indices = @transform_3, window_bounds = array<i64: 1, 8, 256>}]} {
    %c0 = arith.constant 0 : index
    %c0_0 = arith.constant 0 : index
    %c0_1 = arith.constant 0 : index
    %0 = vector.load %arg1[%c0, %c0_0, %c0_1] : memref<1x8x256xf32, #tpu.memory_space<vmem>>, vector<1x8x256xf32>
    %cst = arith.constant dense<0.000000e+00> : vector<1x8xf32>
    %1 = vector.multi_reduction <add>, %0, %cst [2] : vector<1x8x256xf32> to vector<1x8xf32>
    %cst_2 = arith.constant 3.906250e-03 : f32
    %2 = vector.broadcast %cst_2 : f32 to vector<1x8xf32>
    %3 = arith.mulf %1, %2 : vector<1x8xf32>
    %c0_3 = arith.constant 0 : index
    %c0_4 = arith.constant 0 : index
    %4 = vector.load %arg2[%c0_3, %c0_4] : memref<2x8xf32, #tpu.memory_space<vmem>>, vector<2x8xf32>
    %cst_5 = arith.constant dense<0.000000e+00> : vector<1x2xf32>
    %5 = tpu.matmul %3, %4, %cst_5 {dimension_numbers = #tpu.dot_dimension_numbers<[1], [1], [0], [0], [0, 0, 1, 0], [], []>} : vector<1x8xf32>, vector<2x8xf32>, vector<1x2xf32> -> vector<1x2xf32>
    %cst_6 = arith.constant 0.000000e+00 : f32
    %6 = vector.broadcast %cst_6 : f32 to vector<1x2xf32>
    %7 = arith.maximumf %5, %6 : vector<1x2xf32>
    %c0_7 = arith.constant 0 : index
    %c0_8 = arith.constant 0 : index
    %8 = vector.load %arg3[%c0_7, %c0_8] : memref<8x2xf32, #tpu.memory_space<vmem>>, vector<8x2xf32>
    %cst_9 = arith.constant dense<0.000000e+00> : vector<1x8xf32>
    %9 = tpu.matmul %7, %8, %cst_9 {dimension_numbers = #tpu.dot_dimension_numbers<[1], [1], [0], [0], [0, 0, 1, 0], [], []>} : vector<1x2xf32>, vector<8x2xf32>, vector<1x8xf32> -> vector<1x8xf32>
    %cst_10 = arith.constant 3.000000e+00 : f32
    %10 = vector.broadcast %cst_10 : f32 to vector<1x8xf32>
    %11 = arith.addf %9, %10 : vector<1x8xf32>
    %cst_11 = arith.constant 0.000000e+00 : f32
    %cst_12 = arith.constant 6.000000e+00 : f32
    %12 = vector.broadcast %cst_11 : f32 to vector<1x8xf32>
    %13 = arith.maximumf %12, %11 : vector<1x8xf32>
    %14 = vector.broadcast %cst_12 : f32 to vector<1x8xf32>
    %15 = arith.minimumf %14, %13 : vector<1x8xf32>
    %cst_13 = arith.constant 0.166666672 : f32
    %16 = vector.broadcast %cst_13 : f32 to vector<1x8xf32>
    %17 = arith.mulf %15, %16 : vector<1x8xf32>
    %c0_14 = arith.constant 0 : index
    %c0_15 = arith.constant 0 : index
    %c0_16 = arith.constant 0 : index
    %18 = vector.load %arg1[%c0_14, %c0_15, %c0_16] : memref<1x8x256xf32, #tpu.memory_space<vmem>>, vector<1x8x256xf32>
    %19 = vector.shape_cast %17 : vector<1x8xf32> to vector<1x8x1xf32>
    %20 = vector.broadcast %19 : vector<1x8x1xf32> to vector<1x8x256xf32>
    %21 = arith.mulf %18, %20 : vector<1x8x256xf32>
    %c0_17 = arith.constant 0 : index
    %c0_18 = arith.constant 0 : index
    %c0_19 = arith.constant 0 : index
    %22 = vector.load %arg4[%c0_17, %c0_18, %c0_19] : memref<1x8x256xf32, #tpu.memory_space<vmem>>, vector<1x8x256xf32>
    tpu.vector_store %arg4[%c0_17, %c0_18, %c0_19], %21 {strides = array<i32>} : memref<1x8x256xf32, #tpu.memory_space<vmem>>, vector<1x8x256xf32>,
    return
  }
  func.func @transform_0(%arg0: i32) -> (i32, i32, i32) {
    %c0_i32 = arith.constant 0 : i32
    %c0_i32_0 = arith.constant 0 : i32
    %c0_i32_1 = arith.constant 0 : i32
    return %arg0, %c0_i32, %c0_i32_0 : i32, i32, i32
  }
  func.func @transform_1(%arg0: i32) -> (i32, i32) {
    %c0_i32 = arith.constant 0 : i32
    %c0_i32_0 = arith.constant 0 : i32
    %c0_i32_1 = arith.constant 0 : i32
    return %c0_i32, %c0_i32_0 : i32, i32
  }
  func.func @transform_2(%arg0: i32) -> (i32, i32) {
    %c0_i32 = arith.constant 0 : i32
    %c0_i32_0 = arith.constant 0 : i32
    %c0_i32_1 = arith.constant 0 : i32
    return %c0_i32, %c0_i32_0 : i32, i32
  }
  func.func @transform_3(%arg0: i32) -> (i32, i32, i32) {
    %c0_i32 = arith.constant 0 : i32
    %c0_i32_0 = arith.constant 0 : i32
    %c0_i32_1 = arith.constant 0 : i32
    return %arg0, %c0_i32, %c0_i32_0 : i32, i32, i32
  }
}

</mosaic_0001>

<bundles_post_ra>
// kernel: tpu_custom_call.1
= control target key start
LH: loop header
LB: loop body
LE: loop exit
PB: predicated region body
PF: predicated region fallthrough
CT: control target
= control target key end

     0   :  { %8 = vsyncpa [#allocation3], 0  ;;  %s812_s0 = inlined_call_operand.hbm [shape: f32[2,8,256], index: 0, kind: input, shape index: {}]   ;;  %s813_s1 = inlined_call_operand.vmem [shape: f32[2,8], index: 1, kind: input, shape index: {}]   ;;  %s814_s2 = inlined_call_operand.vmem [shape: f32[8,2], index: 2, kind: input, shape index: {}]   ;;  %s815_s3 = inlined_call_operand.hbm [shape: f32[2,8,256], index: 3, kind: output, shape index: {}]  }
   0x1   :  { %10 = vsyncpa [#allocation3 + $0x1], 0 }
   0x2   :  { %11 = vsyncpa [#allocation4], 0 }
   0x3   :  { %13 = vsyncpa [#allocation4 + $0x1], 0  ;;  %s655_s12 = smov 0   ;;  %s657_s13 = smov 0  }
   0x4   :  { %s659_s14 = smov 0   ;;  %s661_s15 = smov 0  }
   0x5 LB: > { %s676_s16 = sadd.s32 4294967295, %s629_s15   ;;  %s455_s17 = sadd.s32 4294967294, %s629_s15   ;;  %s629_s15 = sphi %s661_s15, %s832_s15   ;;  %s625_s14 = sphi %s659_s14, %s831_s14   ;;  %s621_s13 = sphi %s657_s13, %s830_s13   ;;  %s617_s12 = sphi %s655_s12, %s829_s12  }
   0x6   : > { %s680_s18 = sadd.s32 1, %s629_s15   ;;  %s26_s19 = sadd.s32 1, %s625_s14 }
   0x7   : > { %s23_s20 = ssub.s32 %s629_s15, %s680_s18  ;;  %p33_p0 = scmp.ne.s32.totalorder %s625_s14, %s621_s13 }
   0x8   : > { %p24_p1 = scmp.eq.s32.totalorder %s23_s20, 0  ;;  %p34_p2 = scmp.eq.s32.totalorder %s629_s15, 0 }
   0x9   : > { %p39_p3 = scmp.ne.s32.totalorder %s621_s13, %s617_s12  ;;  %p40_p4 = scmp.eq.s32.totalorder %s676_s16, 0 }
   0xa   : > { %s692_s21 = scalar_select %p24_p1, %s625_s14, %s26_s19  }
   0xb   : > { %p694_p5 = por %p34_p2, %p33_p0  ;;  %p698_p6 = por %p40_p4, %p39_p3 }
   0xc   : > { %p105_p7 = scmp.eq.s32.totalorder %s676_s16, 1  ;;  %p111_p8 = scmp.eq.s32.totalorder %s455_s17, 1 }
   0xd   : > { %s819_s23 = scalar_select %p698_p6, 1, 0 }
   0xe   : > { %p501_p10 = scmp.lt.s32.totalorder %s629_s15, 2  ;;  %p705_p11 = por %p105_p7, %p33_p0 }
   0xf   : > { %p709_p12 = por %p111_p8, %p39_p3  ;;  %s137_s26 = sand.u32 1, %s625_s14  }
  0x10   : > { %s820_s24 = scalar_select %p705_p11, 1, 0 }
  0x11   : > { %s821_s25 = scalar_select %p709_p12, 1, 0 }
  0x12   : > { %s473_s27 = sshll.u32 %s629_s15, 8  ;;  %s458_s28 = sshll.u32 %s137_s26, 4 }
  0x13   : > { %s718_s4 = scalar_lea.hbm %s812_s0, %s473_s27  ;;  %s141_s5 = scalar_lea.vmem [#allocation2], %s458_s28 }
  0x14   : > { %s149_s6 = sshll.u32 %s141_s5, 4  ;;  %p722_p13 = pnand %p501_p10, %p694_p5  ;;  %s726_s6 = int_to_ptr.vmem [resolvable:$true] %s149_s6 }
  0x15   : > { %s138_s8 = scalar_lea.sflag [#allocation3], %s137_s26  ;;  %s537_s9 = scalar_lea.hbm %s718_s4, 256 }
  0x16   : > { %p538_p2 = scmp.ne.s32.totalorder %s718_s4, %s537_s9  ;;  %p539_p3 = pneg %p722_p13 }
  0x17   : > { %s542_s17 = scalar_lea.hbm %s812_s0, 512  ;;  %p543_p5 = scmp.lt.s32.totalorder %s718_s4, %s812_s0 }
  0x18   : > { %p540_p4 = pnand %p539_p3, %p538_p2  ;;  %p544_p8 = scmp.lt.s32.totalorder %s542_s17, %s537_s9 }
  0x1a   : > { %p541_p7 = pneg %p540_p4  ;;  %p545_p10 = por %p544_p8, %p543_p5 }
  0x1c   : > { %p546_p9 = pnand %p545_p10, %p541_p7 }
  0x1e   : > { %549 = shalt.err (!%p546_p9)
}
  0x1f   : > { %s550_s22 = scalar_lea.vmem %s726_s6, 256  ;;  %s631_s26 = smov [#allocation2]  }
  0x20   : > { %p551_p0 = scmp.ne.s32.totalorder %s726_s6, %s550_s22  ;;  %s555_s27 = sshll.u32 %s631_s26, 4  ;;  %s556_s27 = int_to_ptr.vmem [resolvable:$false] %s555_s27 }
  0x21   : > { %s557_s28 = scalar_lea.vmem %s556_s27, 512  ;;  %p558_p4 = scmp.lt.s32.totalorder %s726_s6, %s556_s27 }
  0x22   : > { %p553_p1 = pnand %p551_p0, %p539_p3  ;;  %p559_p12 = scmp.lt.s32.totalorder %s557_s28, %s550_s22 }
  0x24   : > { %p554_p2 = pneg %p553_p1  ;;  %p560_p11 = por %p559_p12, %p558_p4 }
  0x26   : > { %p561_p6 = pnand %p560_p11, %p554_p2 }
  0x28   : > { %564 = shalt.err (!%p561_p6)
}
  0x29   : > { %496 = dma.hbm_to_vmem [thread:$0]  (!%p722_p13), %s718_s4, 256, %s726_s6, %s138_s8  }
  0x2a   : > { %p823_p9 = scmp.lt.s32.totalorder %s629_s15, 3  ;;  %p824_p7 = scmp.ge.s32.totalorder %s629_s15, 1 }
  0x2c   : > { %p155_p0 = pnand %p824_p7, %p823_p9 }
  0x2d   : > { %s753_s29 = sand.u32 (!%p155_p0), 1, %s621_s13   ;;  %p825_p6 = scmp.ne.s32.totalorder (!%p155_p0), %s819_s23, 0 }
  0x2e   : > { %158 = sbr.rel (%p155_p0) target bundleno = 725 (0x2d5), region = 32  ;;  %s462_s30 = sshll.u32 (!%p155_p0), %s753_s29, 4 }
  0x2f   : > { %s161_s5 = scalar_lea.sflag (!%p155_p0), [#allocation3], %s753_s29  ;;  %s164_s7 = scalar_lea.vmem (!%p155_p0), [#allocation2], %s462_s30 }
  0x33   : > { %608 = dma.done.wait (%p825_p6), %s161_s5, 256  }
  0x34   : > { %610 = vsyncadd (%p825_p6), %s161_s5, 4294967040  ;;  %v187_v0 = vld [vmem:[%s164_s7] sm:$0xff]  ;;  %v188_v1 = vld [vmem:[%s164_s7 + $0x8] sm:$0xff]  ;;  %v632_v3 = vmov 0.0   ;;  %vm201_vm0 = vcmask 64512   ;;  %vm633_vm1 = vmmov 0   ;;  %v195_v5 = vlaneseq }
  0x35   : > { %v189_v2 = vadd.f32 %v188_v1, %v187_v0  ;;  %479 = vmatprep.subr.mxu0 %v632_v3  ;;  %v193_v4 = vld [vmem:[%s813_s1] sm:$0x3]  ;;  %484 = vmatprep.subr.mxu1 %v632_v3  ;;  %vm279_vm2 = vcmask 15360   ;;  %s474_s9 = sshll.u32 %s676_s16, 8  ;;  %s186_s10 = scalar_lea.vmem [#allocation5], %s462_s30 }
  0x36   : > { %480 = vmatpush3.xpose.msk.msra.mxu0 %vm201_vm0, %v193_v4  ;;  %481 = vmatprep.mubr.msk.f32.mxu0 %vm633_vm1, %v632_v3  ;;  %v196_v6 = vand.u32 127, %v195_v5  ;;  %v198_v7 = vshrl.u32 %v195_v5, 7  ;;  %v278_v12 = vld [vmem:[%s814_s2] sm:$0xff]  ;;  %s385_s11 = sshll.u32 %s186_s10, 4  ;;  %s775_s20 = scalar_lea.hbm %s815_s3, %s474_s9  ;;  %s386_s11 = int_to_ptr.vmem [resolvable:$true] %s385_s11 }
  0x37   : > { %190 = vadd.xlane.f32.xlu0 %v189_v2  ;;  %486 = vmatprep.mubr.msk.f32.mxu1 %vm633_vm1, %v632_v3  ;;  %s371_s22 = scalar_lea.sflag [#allocation4], %s753_s29  ;;  %s565_s26 = scalar_lea.vmem %s386_s11, 256 }
  0x38   : > { %v199_v8 = vsub.s32 %v196_v6, %v198_v7  ;;  %485 = vmatpush3.xpose.msk.msra.mxu1 %vm279_vm2, %v278_v12  ;;  %v361_v21 = vsub.s32 0, %v198_v7  ;;  %p566_p11 = scmp.ne.s32.totalorder %s386_s11, %s565_s26  ;;  %p826_p12 = scmp.ne.s32.totalorder %s820_s24, 0 }
  0x39   : > { %s634_s16 = smov [#allocation5]  }
  0x3a   : > { %p567_p13 = pnand %p566_p11, %p826_p12  ;;  %s569_s27 = sshll.u32 %s634_s16, 4  ;;  %s570_s27 = int_to_ptr.vmem [resolvable:$false] %s569_s27 }
  0x3b   : > { %s571_s28 = scalar_lea.vmem %s570_s27, 512  ;;  %p572_p3 = scmp.lt.s32.totalorder %s386_s11, %s570_s27 }
  0x3c   : > { %p568_p1 = pneg %p567_p13  ;;  %p573_p5 = scmp.lt.s32.totalorder %s571_s28, %s565_s26 }
  0x3e   : > { %p574_p8 = por %p573_p5, %p572_p3 }
  0x40   : > { %p575_p10 = pnand %p574_p8, %p568_p1 }
  0xc0   : > { %v191_v9 = vpop.xlane.xlu0 %190 }
  0xc1   : > { %v192_v10 = vmul.f32 0.00390625, %v191_v9 }
  0xc3   : > { %v200_v11 = vrot.slane %v192_v10, %v199_v8 }
  0xc5   : > { %482 = vmatmul.mubr.msk.f32.vlgmr.msra.gmra.mxu0 %vm201_vm0, %v200_v11 }
 0x185   : > { %v273_v13 = vpop.f32.mrf.mxu0 }
 0x186   : > { %v277_v14 = vmax.f32 %v273_v13, 0.0 }
 0x187   : > { %v483_v15 = vpop.f32.mrf.mxu0 }
 0x188   : > { %487 = vmatmul.mubr.msk.f32.vlgmr.msra.gmra.mxu1 %vm279_vm2, %v277_v14 }
 0x248   : > { %v352_v16 = vpop.f32.mrf.mxu1 }
 0x249   : > { %v353_v17 = vadd.f32 3.0, %v352_v16 }
 0x24a   : > { %v488_v18 = vpop.f32.mrf.mxu1 }
 0x24b   : > { %v356_v19 = vmax.f32 %v353_v17, 0.0 }
 0x24d   : > { %v357_v20 = vmin.f32 %v356_v19, 6.0 }
 0x24f   : > { %v358_v22 = vmul.f32 0.16666667, %v357_v20 }
 0x251   : > { %v362_v23 = vrot.slane %v358_v22, %v361_v21 }
 0x253   : > { %364 = vbcast.lane.b32.xlu0 %v362_v23, 256 }
 0x2c5   : > { %v365_v24 = vpop.permute.xlu0 %364 }
 0x2c6   : > { %v366_v25 = vmul.f32 %v365_v24, %v187_v0  ;;  %v367_v26 = vmul.f32 %v365_v24, %v188_v1 }
 0x2c8   : > { %368 = vst [vmem:[%s186_s10] sm:$0xff] %v366_v25  ;;  %369 = vst [vmem:[%s186_s10 + $0x8] sm:$0xff] %v367_v26 }
 0x2c9   : > { %578 = shalt.err (!%p575_p10)
}
 0x2ca   : > { %s579_s30 = scalar_lea.hbm %s775_s20, 256  ;;  %s583_s7 = scalar_lea.hbm %s815_s3, 512 }
 0x2cb   : > { %p580_p2 = scmp.ne.s32.totalorder %s775_s20, %s579_s30  ;;  %p584_p7 = scmp.lt.s32.totalorder %s775_s20, %s815_s3 }
 0x2cc   : > { %p585_p0 = scmp.lt.s32.totalorder %s583_s7, %s579_s30 }
 0x2cd   : > { %p581_p4 = pnand %p580_p2, %p826_p12 }
 0x2ce   : > { %p586_p6 = por %p585_p0, %p584_p7 }
 0x2cf   : > { %p582_p9 = pneg %p581_p4 }
 0x2d1   : > { %p587_p11 = pnand %p586_p6, %p582_p9 }
 0x2d3   : > { %590 = shalt.err (!%p587_p11)
}
 0x2d4   : > { %491 = dma.vmem_to_hbm [thread:$0]  (%p826_p12), %s386_s11, 256, %s775_s20, %s371_s22  }
 0x2d5 PF: > { %s397_s23 = sand.u32 1, %s617_s12   ;;  %p827_p13 = scmp.ne.s32.totalorder %s821_s25, 0 }
 0x2d6   : > { %p828_p1 = scmp.ge.s32.totalorder %s629_s15, 2  ;;  %s398_s8 = scalar_lea.sflag [#allocation4], %s397_s23 }
 0x2d8   : > { %p498_p3 = pnand %p828_p1, %p827_p13 }
 0x2da   : > { %p499_p5 = pneg %p498_p3 }
 0x2dc   : > { %612 = dma.done.wait (%p499_p5), %s398_s8, 256  }
 0x2dd   : > { %614 = vsyncadd (%p499_p5), %s398_s8, 4294967040  ;;  %p16_p8 = scmp.ge.s32.totalorder %s680_s18, 4   ;;  %s829_s12 = smov %s621_s13 }
 0x2de   : > { %s830_s13 = smov %s625_s14  ;;  %s831_s14 = smov %s692_s21 }
 0x2df   : > { %s832_s15 = smov %s680_s18  ;;  %18 = sbr.rel (!%p16_p8) target bundleno = 5 (0x5), region = 77 }
 0x2e4   :  { %403 = vsyncpa [#allocation3], 1 }
 0x2e5   :  { %405 = vsyncpa [#allocation3 + $0x1], 1 }
 0x2e6   :  { %406 = vsyncpa [#allocation4], 1 }
 0x2e7   :  { %408 = vsyncpa [#allocation4 + $0x1], 1 }

</bundles_post_ra>
